<compile_context>
chip_gen: v5e
topology: v5e:2x2
jax: 0.10.0
libtpu: 0.0.40
codegen_flags: <defaults>
</compile_context>

<pallas_src>
import functools

import jax
import jax.numpy as jnp
from jax import lax
from jax.experimental import pallas as pl
from jax.experimental.pallas import tpu as pltpu


_NT_DIMS = (((1,), (1,)), ((), ()))     # contract the last dim of both operands


def _round_up(x, m):
    return (x + m - 1) // m * m


def _hw_params():
    """Generation-aware knobs: VMEM limit, max query tile, bf16-exp support."""
    kind = ""
    try:
        kind = jax.devices()[0].device_kind.lower()
    except Exception:
        pass
    vmem_cap = None
    try:
        vmem_cap = int(pltpu.get_tpu_info().vmem_capacity_bytes)
    except Exception:
        vmem_cap = None
    if vmem_cap is None:
        if "v5" in kind or "v6" in kind:
            vmem_cap = 128 * 1024 * 1024
        elif "v2" in kind or "v3" in kind:
            vmem_cap = 16 * 1024 * 1024
        else:                                  # v7x / unknown: be conservative
            vmem_cap = 64 * 1024 * 1024
    # Never request the full physical VMEM; leave headroom for Mosaic scratch.
    vmem_limit = max(12 * 1024 * 1024,
                     min(int(vmem_cap * 0.8), 100 * 1024 * 1024))
    # bf16 EUP (fast bf16 exp) exists on v6e / v7x; keep f32 exp on v5e & older.
    has_bf16_exp = any(t in kind for t in ("v6", "v7", "tpu7"))
    max_tq = 512 if vmem_cap <= 64 * 1024 * 1024 else 1024
    return vmem_limit, max_tq, has_bf16_exp


def _main_vmem_bytes(c, c8p, n_pad, tq):
    """Rough live-VMEM estimate for one grid step of the main kernel."""
    return (2 * c * tq * 4            # x tile (double buffered)
            + 2 * c * tq * 4          # out tile (double buffered)
            + 2 * c * c * 2           # CAM attention A (bf16)
            + 2 * tq * c8p * 2        # Q^T tile (bf16)
            + 2 * c8p * n_pad * 2     # K (bf16)
            + 2 * c * n_pad * 2       # V (bf16)
            + 2 * n_pad * 4           # key-mask row
            + tq * n_pad * 4          # f32 score slab
            + tq * n_pad * 2          # bf16 exp slab
            + 4 * c * tq * 4)         # cam / pam / misc f32 temps


def _pick_tq(n_pad, c, c8p, max_tq, vmem_limit):
    cands = [t for t in (1024, 512, 256, 128) if t <= max_tq and n_pad % t == 0]
    if not cands:
        return n_pad
    budget = int(vmem_limit * 0.8)
    for need_multi in (True, False):           # prefer >= 2 query tiles
        for t in cands:
            if need_multi and n_pad // t < 2:
                continue
            if _main_vmem_bytes(c, c8p, n_pad, t) <= budget:
                return t
    return cands[-1]


def sam_precompute_kernel(x_ref, wq_ref, wk_ref, wv_ref, bq_ref, bk_ref, bv_ref,
                          a_ref, qT_ref, k_ref, v_ref):
    """Per-batch: CAM attention matrix + Q^T / K / V projections."""
    xb = x_ref[...].astype(jnp.bfloat16)                              # (C, N)

    # CAM energy: bf16 operands, f32 accumulation.  A = softmax(rowmax(E)-E)
    # with exact normalization (A is reused by every query tile).
    energy = lax.dot_general(xb, xb, _NT_DIMS,
                             preferred_element_type=jnp.float32)      # (C, C)
    energy_new = jnp.max(energy, axis=-1, keepdims=True) - energy
    em = jnp.exp(energy_new - jnp.max(energy_new, axis=-1, keepdims=True))
    a_ref[...] = (em / jnp.sum(em, axis=-1, keepdims=True)).astype(a_ref.dtype)

    # Per-slice 1x1-conv projections, written straight to their outputs.
    q = jnp.dot(wq_ref[...], xb, preferred_element_type=jnp.float32) + bq_ref[...]
    qT_ref[...] = q.T.astype(qT_ref.dtype)                            # (N, C8p)
    k = jnp.dot(wk_ref[...], xb, preferred_element_type=jnp.float32) + bk_ref[...]
    k_ref[...] = k.astype(k_ref.dtype)                                # (C8p, N)
    v = jnp.dot(wv_ref[...], xb, preferred_element_type=jnp.float32) + bv_ref[...]
    v_ref[...] = v.astype(v_ref.dtype)                                # (C, N)


def sam_main_kernel(n_valid, n_pad, use_bf16_exp,
                    x_ref, a_ref, qT_ref, k_ref, v_ref, mask_ref, gam_ref,
                    out_ref):
    x_t = x_ref[...].astype(jnp.float32)                              # (C, TQ)

    # ---- CAM tile: A @ X_t
    cam = jnp.dot(a_ref[...], x_t.astype(jnp.bfloat16),
                  preferred_element_type=jnp.float32)                 # (C, TQ)

    # ---- PAM tile (flash-style; only a (TQ, N) slab is ever live)
    s = jnp.dot(qT_ref[...], k_ref[...],
                preferred_element_type=jnp.float32)                   # (TQ, N)
    if n_valid < n_pad:                                               # static branch
        s = s + mask_ref[...]                                         # -1e30 on pads
    z = s - jnp.max(s, axis=-1, keepdims=True)
    e = jnp.exp(z.astype(jnp.bfloat16) if use_bf16_exp else z)
    e_b = e.astype(jnp.bfloat16)                                      # (TQ, N)

    # Row sums via a ones-row MXU matmul: lands directly in (1, TQ) so the
    # deferred-normalization scale broadcasts along C with no relayout.
    ones_row = jnp.ones((1, e_b.shape[-1]), dtype=jnp.bfloat16)
    rs = lax.dot_general(ones_row, e_b, _NT_DIMS,
                         preferred_element_type=jnp.float32)          # (1, TQ)
    pam_un = lax.dot_general(v_ref[...], e_b, _NT_DIMS,
                             preferred_element_type=jnp.float32)      # (C, TQ)

    g_cam = gam_ref[0]
    g_pam = gam_ref[1]
    scale = g_pam * pl.reciprocal(rs, approx=True)                    # (1, TQ)
    out_ref[...] = (g_cam * cam + pam_un * scale + 2.0 * x_t).astype(out_ref.dtype)


def sa_module_forward(x_nchw, params, tq=None):
    """x_nchw: (B, C, H, W) float32.  Returns (B, C, H, W)."""
    B, C, H, W = x_nchw.shape
    assert C >= 8, "SAModule uses C // 8 query/key channels"
    n0 = H * W
    c8 = C // 8
    c8p = _round_up(c8, 16)                 # bf16 sublane-pack aligned Q/K rows
    n_pad = _round_up(max(n0, 128), 128)    # lane-dense spatial axis

    vmem_limit, max_tq, use_bf16_exp = _hw_params()
    if tq is None:
        tq = _pick_tq(n_pad, C, c8p, max_tq, vmem_limit)
    n_qt = n_pad // tq

    x_flat = x_nchw.reshape(B, C, n0)
    if n_pad != n0:
        x_flat = jnp.pad(x_flat, ((0, 0), (0, 0), (0, n_pad - n0)))

    def pad_rows(w):
        return jnp.pad(w, ((0, c8p - w.shape[0]), (0, 0)))

    def pad_vec(b):
        return jnp.pad(b, (0, c8p - b.shape[0]))

    wq = pad_rows(params["wq"]).astype(jnp.bfloat16)                  # (C8p, C)
    wk = pad_rows(params["wk"]).astype(jnp.bfloat16)                  # (C8p, C)
    wv = params["wv"].astype(jnp.bfloat16)                            # (C, C)
    bq = pad_vec(params["bq"]).reshape(c8p, 1).astype(jnp.float32)
    bk = pad_vec(params["bk"]).reshape(c8p, 1).astype(jnp.float32)
    bv = params["bv"].reshape(C, 1).astype(jnp.float32)
    gammas = jnp.concatenate(
        [params["gamma_cam"].reshape(1), params["gamma_pam"].reshape(1)]
    ).astype(jnp.float32)                                             # (2,) -> SMEM

    # Additive key mask (0 on valid columns, -1e30 on padded ones).
    mask_row = jnp.where(jnp.arange(n_pad)[None, :] < n0,
                         jnp.float32(0.0), jnp.float32(-1e30))        # (1, n_pad)

    # ---------------- per-batch precompute: A, Q^T, K, V ----------------
    a_c, q_t, k_p, v_p = pl.pallas_call(
        sam_precompute_kernel,
        out_shape=(
            jax.ShapeDtypeStruct((B, C, C), jnp.bfloat16),            # A
            jax.ShapeDtypeStruct((B, n_pad, c8p), jnp.bfloat16),      # Q^T
            jax.ShapeDtypeStruct((B, c8p, n_pad), jnp.bfloat16),      # K
            jax.ShapeDtypeStruct((B, C, n_pad), jnp.bfloat16),        # V
        ),
        grid_spec=pltpu.PrefetchScalarGridSpec(
            num_scalar_prefetch=0,
            grid=(B,),
            in_specs=[
                pl.BlockSpec((None, C, n_pad), lambda b: (b, 0, 0)),
                pl.BlockSpec((c8p, C), lambda b: (0, 0)),
                pl.BlockSpec((c8p, C), lambda b: (0, 0)),
                pl.BlockSpec((C, C), lambda b: (0, 0)),
                pl.BlockSpec((c8p, 1), lambda b: (0, 0)),
                pl.BlockSpec((c8p, 1), lambda b: (0, 0)),
                pl.BlockSpec((C, 1), lambda b: (0, 0)),
            ],
            out_specs=[
                pl.BlockSpec((None, C, C), lambda b: (b, 0, 0)),
                pl.BlockSpec((None, n_pad, c8p), lambda b: (b, 0, 0)),
                pl.BlockSpec((None, c8p, n_pad), lambda b: (b, 0, 0)),
                pl.BlockSpec((None, C, n_pad), lambda b: (b, 0, 0)),
            ],
        ),
        compiler_params=pltpu.CompilerParams(
            dimension_semantics=("parallel",),
            vmem_limit_bytes=vmem_limit,
        ),
    )(x_flat, wq, wk, wv, bq, bk, bv)

    # ---------------- main kernel: CAM apply + flash PAM + residuals ----------------
    kernel = functools.partial(sam_main_kernel, n0, n_pad, use_bf16_exp)
    out = pl.pallas_call(
        kernel,
        out_shape=jax.ShapeDtypeStruct((B, C, n_pad), x_nchw.dtype),
        grid_spec=pltpu.PrefetchScalarGridSpec(
            num_scalar_prefetch=0,
            grid=(B, n_qt),
            in_specs=[
                pl.BlockSpec((None, C, tq), lambda b, q: (b, 0, q)),       # x tile
                pl.BlockSpec((None, C, C), lambda b, q: (b, 0, 0)),        # A
                pl.BlockSpec((None, tq, c8p), lambda b, q: (b, q, 0)),     # Q^T tile
                pl.BlockSpec((None, c8p, n_pad), lambda b, q: (b, 0, 0)),  # K
                pl.BlockSpec((None, C, n_pad), lambda b, q: (b, 0, 0)),    # V
                pl.BlockSpec((1, n_pad), lambda b, q: (0, 0)),             # key mask
                pl.BlockSpec(memory_space=pltpu.MemorySpace.SMEM),         # gammas
            ],
            out_specs=pl.BlockSpec((None, C, tq), lambda b, q: (b, 0, q)),
        ),
        compiler_params=pltpu.CompilerParams(
            dimension_semantics=("parallel", "parallel"),
            vmem_limit_bytes=vmem_limit,
        ),
    )(x_flat, a_c, q_t, k_p, v_p, mask_row, gammas)

    return out[:, :, :n0].reshape(B, C, H, W)


def sa_module_reference(x, params):
    """Pure-JAX f32 reference mirroring the PyTorch forward."""
    B, C, H, W = x.shape
    N = H * W
    xf = x.reshape(B, C, N)

    # CAM
    energy = jnp.einsum("bcn,bdn->bcd", xf, xf)
    energy_new = jnp.max(energy, axis=-1, keepdims=True) - energy
    att_c = jax.nn.softmax(energy_new, axis=-1)
    cam = jnp.einsum("bcd,bdn->bcn", att_c, xf)
    cam = params["gamma_cam"][0] * cam + xf

    # PAM
    q = jnp.einsum("oc,bcn->bon", params["wq"], xf) + params["bq"][None, :, None]
    k = jnp.einsum("oc,bcn->bon", params["wk"], xf) + params["bk"][None, :, None]
    v = jnp.einsum("oc,bcn->bon", params["wv"], xf) + params["bv"][None, :, None]
    energy_p = jnp.einsum("bon,bom->bnm", q, k)
    att_p = jax.nn.softmax(energy_p, axis=-1)
    pam = jnp.einsum("bcm,bnm->bcn", v, att_p)
    pam = params["gamma_pam"][0] * pam + xf

    return (cam + pam).reshape(B, C, H, W)


if __name__ == "__main__":
    B, C, H, W = 2, 16, 16, 16      # C // 8 = 2 query/key channels; N = 256 (2 query tiles)
    c8 = C // 8

    key = jax.random.PRNGKey(0)
    keys = jax.random.split(key, 9)

    x = jax.random.normal(keys[0], (B, C, H, W), dtype=jnp.float32)

    # 1x1 Conv2d weights (out, in, 1, 1) squeezed to (out, in).  PyTorch inits
    # gamma to zero; use nonzero values so the attention paths contribute.
    params = {
        "wq": 0.1 * jax.random.normal(keys[1], (c8, C), dtype=jnp.float32),
        "bq": 0.1 * jax.random.normal(keys[2], (c8,), dtype=jnp.float32),
        "wk": 0.1 * jax.random.normal(keys[3], (c8, C), dtype=jnp.float32),
        "bk": 0.1 * jax.random.normal(keys[4], (c8,), dtype=jnp.float32),
        "wv": 0.1 * jax.random.normal(keys[5], (C, C), dtype=jnp.float32),
        "bv": 0.1 * jax.random.normal(keys[6], (C,), dtype=jnp.float32),
        "gamma_cam": 0.5 * jax.random.normal(keys[7], (1,), dtype=jnp.float32),
        "gamma_pam": 0.5 * jax.random.normal(keys[8], (1,), dtype=jnp.float32),
    }

    out = jax.block_until_ready(sa_module_forward(x, params))
    ref = jax.block_until_ready(sa_module_reference(x, params))

    assert out.shape == (B, C, H, W)
    # Kernel uses bf16 MXU operands (and bf16 exp on v6e/v7x) with f32
    # accumulation; compare against the pure-f32 reference with a tolerance
    # sized for bf16 rounding.
    assert jnp.allclose(out, ref, atol=5e-2, rtol=5e-2), "mismatch vs reference"

    print("KERNEL_OK")
</pallas_src>

<mosaic_0001>
module attributes {stable_mosaic.version = 11 : i64} {
  func.func @sam_precompute_kernel(%arg0: i32, %arg1: memref<1x16x256xf32, #tpu.memory_space<vmem>>, %arg2: memref<16x16xbf16, #tpu.memory_space<vmem>>, %arg3: memref<16x16xbf16, #tpu.memory_space<vmem>>, %arg4: memref<16x16xbf16, #tpu.memory_space<vmem>>, %arg5: memref<16x1xf32, #tpu.memory_space<vmem>>, %arg6: memref<16x1xf32, #tpu.memory_space<vmem>>, %arg7: memref<16x1xf32, #tpu.memory_space<vmem>>, %arg8: memref<1x16x16xbf16, #tpu.memory_space<vmem>>, %arg9: memref<1x256x16xbf16, #tpu.memory_space<vmem>>, %arg10: memref<1x16x256xbf16, #tpu.memory_space<vmem>>, %arg11: memref<1x16x256xbf16, #tpu.memory_space<vmem>>) attributes {dimension_semantics = [#tpu.dimension_semantics<parallel>], iteration_bounds = array<i64: 2>, scalar_prefetch = 0 : i64, scratch_operands = 0 : i64, tpu.core_type = #tpu.core_type<tc>, window_params = [{transform_indices = @transform_0, window_bounds = array<i64: 1, 16, 256>}, {pipeline_mode = #tpu.pipeline_mode<synchronous>, transform_indices = @transform_1, window_bounds = array<i64: 16, 16>}, {pipeline_mode = #tpu.pipeline_mode<synchronous>, transform_indices = @transform_2, window_bounds = array<i64: 16, 16>}, {pipeline_mode = #tpu.pipeline_mode<synchronous>, transform_indices = @transform_3, window_bounds = array<i64: 16, 16>}, {pipeline_mode = #tpu.pipeline_mode<synchronous>, transform_indices = @transform_4, window_bounds = array<i64: 16, 1>}, {pipeline_mode = #tpu.pipeline_mode<synchronous>, transform_indices = @transform_5, window_bounds = array<i64: 16, 1>}, {pipeline_mode = #tpu.pipeline_mode<synchronous>, transform_indices = @transform_6, window_bounds = array<i64: 16, 1>}, {transform_indices = @transform_7, window_bounds = array<i64: 1, 16, 16>}, {transform_indices = @transform_8, window_bounds = array<i64: 1, 256, 16>}, {transform_indices = @transform_9, window_bounds = array<i64: 1, 16, 256>}, {transform_indices = @transform_10, window_bounds = array<i64: 1, 16, 256>}]} {
    %c0 = arith.constant 0 : index
    %c0_0 = arith.constant 0 : index
    %c0_1 = arith.constant 0 : index
    %0 = vector.load %arg1[%c0, %c0_0, %c0_1] : memref<1x16x256xf32, #tpu.memory_space<vmem>>, vector<1x16x256xf32>
    %1 = vector.shape_cast %0 : vector<1x16x256xf32> to vector<16x256xf32>
    %2 = arith.truncf %1 : vector<16x256xf32> to vector<16x256xbf16>
    %cst = arith.constant dense<0.000000e+00> : vector<16x16xf32>
    %3 = tpu.matmul %2, %2, %cst {dimension_numbers = #tpu.dot_dimension_numbers<[1], [1], [0], [0], [0, 0, 1, 0], [], []>} : vector<16x256xbf16>, vector<16x256xbf16>, vector<16x16xf32> -> vector<16x16xf32>
    %cst_2 = arith.constant dense<0xFF800000> : vector<16xf32>
    %4 = vector.multi_reduction <maximumf>, %3, %cst_2 [1] : vector<16x16xf32> to vector<16xf32>
    %5 = vector.shape_cast %4 : vector<16xf32> to vector<16x1xf32>
    %6 = vector.broadcast %5 : vector<16x1xf32> to vector<16x16xf32>
    %7 = arith.subf %6, %3 : vector<16x16xf32>
    %cst_3 = arith.constant dense<0xFF800000> : vector<16xf32>
    %8 = vector.multi_reduction <maximumf>, %7, %cst_3 [1] : vector<16x16xf32> to vector<16xf32>
    %9 = vector.shape_cast %8 : vector<16xf32> to vector<16x1xf32>
    %10 = vector.broadcast %9 : vector<16x1xf32> to vector<16x16xf32>
    %11 = arith.subf %7, %10 : vector<16x16xf32>
    %12 = math.exp %11 : vector<16x16xf32>
    %cst_4 = arith.constant dense<0.000000e+00> : vector<16xf32>
    %13 = vector.multi_reduction <add>, %12, %cst_4 [1] : vector<16x16xf32> to vector<16xf32>
    %14 = vector.shape_cast %13 : vector<16xf32> to vector<16x1xf32>
    %15 = vector.broadcast %14 : vector<16x1xf32> to vector<16x16xf32>
    %16 = arith.divf %12, %15 : vector<16x16xf32>
    %17 = arith.truncf %16 : vector<16x16xf32> to vector<16x16xbf16>
    %c0_5 = arith.constant 0 : index
    %c0_6 = arith.constant 0 : index
    %c0_7 = arith.constant 0 : index
    %18 = vector.load %arg8[%c0_5, %c0_6, %c0_7] : memref<1x16x16xbf16, #tpu.memory_space<vmem>>, vector<1x16x16xbf16>
    %19 = vector.shape_cast %18 : vector<1x16x16xbf16> to vector<16x16xbf16>
    %20 = vector.shape_cast %17 : vector<16x16xbf16> to vector<1x16x16xbf16>
    tpu.vector_store %arg8[%c0_5, %c0_6, %c0_7], %20 {strides = array<i32>} : memref<1x16x16xbf16, #tpu.memory_space<vmem>>, vector<1x16x16xbf16>,
    %c0_8 = arith.constant 0 : index
    %c0_9 = arith.constant 0 : index
    %21 = vector.load %arg2[%c0_8, %c0_9] : memref<16x16xbf16, #tpu.memory_space<vmem>>, vector<16x16xbf16>
    %cst_10 = arith.constant dense<0.000000e+00> : vector<16x256xf32>
    %22 = tpu.matmul %21, %2, %cst_10 {dimension_numbers = #tpu.dot_dimension_numbers<[1], [0], [0], [1], [0, 0, 1, 1], [], []>} : vector<16x16xbf16>, vector<16x256xbf16>, vector<16x256xf32> -> vector<16x256xf32>
    %c0_11 = arith.constant 0 : index
    %c0_12 = arith.constant 0 : index
    %23 = vector.load %arg5[%c0_11, %c0_12] : memref<16x1xf32, #tpu.memory_space<vmem>>, vector<16x1xf32>
    %24 = vector.broadcast %23 : vector<16x1xf32> to vector<16x256xf32>
    %25 = arith.addf %22, %24 : vector<16x256xf32>
    %26 = tpu.transpose %25, [1, 0] : vector<16x256xf32> -> vector<256x16xf32>
    %27 = arith.truncf %26 : vector<256x16xf32> to vector<256x16xbf16>
    %c0_13 = arith.constant 0 : index
    %c0_14 = arith.constant 0 : index
    %c0_15 = arith.constant 0 : index
    %28 = vector.load %arg9[%c0_13, %c0_14, %c0_15] : memref<1x256x16xbf16, #tpu.memory_space<vmem>>, vector<1x256x16xbf16>
    %29 = vector.shape_cast %28 : vector<1x256x16xbf16> to vector<256x16xbf16>
    %30 = vector.shape_cast %27 : vector<256x16xbf16> to vector<1x256x16xbf16>
    tpu.vector_store %arg9[%c0_13, %c0_14, %c0_15], %30 {strides = array<i32>} : memref<1x256x16xbf16, #tpu.memory_space<vmem>>, vector<1x256x16xbf16>,
    %c0_16 = arith.constant 0 : index
    %c0_17 = arith.constant 0 : index
    %31 = vector.load %arg3[%c0_16, %c0_17] : memref<16x16xbf16, #tpu.memory_space<vmem>>, vector<16x16xbf16>
    %cst_18 = arith.constant dense<0.000000e+00> : vector<16x256xf32>
    %32 = tpu.matmul %31, %2, %cst_18 {dimension_numbers = #tpu.dot_dimension_numbers<[1], [0], [0], [1], [0, 0, 1, 1], [], []>} : vector<16x16xbf16>, vector<16x256xbf16>, vector<16x256xf32> -> vector<16x256xf32>
    %c0_19 = arith.constant 0 : index
    %c0_20 = arith.constant 0 : index
    %33 = vector.load %arg6[%c0_19, %c0_20] : memref<16x1xf32, #tpu.memory_space<vmem>>, vector<16x1xf32>
    %34 = vector.broadcast %33 : vector<16x1xf32> to vector<16x256xf32>
    %35 = arith.addf %32, %34 : vector<16x256xf32>
    %36 = arith.truncf %35 : vector<16x256xf32> to vector<16x256xbf16>
    %c0_21 = arith.constant 0 : index
    %c0_22 = arith.constant 0 : index
    %c0_23 = arith.constant 0 : index
    %37 = vector.load %arg10[%c0_21, %c0_22, %c0_23] : memref<1x16x256xbf16, #tpu.memory_space<vmem>>, vector<1x16x256xbf16>
    %38 = vector.shape_cast %37 : vector<1x16x256xbf16> to vector<16x256xbf16>
    %39 = vector.shape_cast %36 : vector<16x256xbf16> to vector<1x16x256xbf16>
    tpu.vector_store %arg10[%c0_21, %c0_22, %c0_23], %39 {strides = array<i32>} : memref<1x16x256xbf16, #tpu.memory_space<vmem>>, vector<1x16x256xbf16>,
    %c0_24 = arith.constant 0 : index
    %c0_25 = arith.constant 0 : index
    %40 = vector.load %arg4[%c0_24, %c0_25] : memref<16x16xbf16, #tpu.memory_space<vmem>>, vector<16x16xbf16>
    %cst_26 = arith.constant dense<0.000000e+00> : vector<16x256xf32>
    %41 = tpu.matmul %40, %2, %cst_26 {dimension_numbers = #tpu.dot_dimension_numbers<[1], [0], [0], [1], [0, 0, 1, 1], [], []>} : vector<16x16xbf16>, vector<16x256xbf16>, vector<16x256xf32> -> vector<16x256xf32>
    %c0_27 = arith.constant 0 : index
    %c0_28 = arith.constant 0 : index
    %42 = vector.load %arg7[%c0_27, %c0_28] : memref<16x1xf32, #tpu.memory_space<vmem>>, vector<16x1xf32>
    %43 = vector.broadcast %42 : vector<16x1xf32> to vector<16x256xf32>
    %44 = arith.addf %41, %43 : vector<16x256xf32>
    %45 = arith.truncf %44 : vector<16x256xf32> to vector<16x256xbf16>
    %c0_29 = arith.constant 0 : index
    %c0_30 = arith.constant 0 : index
    %c0_31 = arith.constant 0 : index
    %46 = vector.load %arg11[%c0_29, %c0_30, %c0_31] : memref<1x16x256xbf16, #tpu.memory_space<vmem>>, vector<1x16x256xbf16>
    %47 = vector.shape_cast %46 : vector<1x16x256xbf16> to vector<16x256xbf16>
    %48 = vector.shape_cast %45 : vector<16x256xbf16> to vector<1x16x256xbf16>
    tpu.vector_store %arg11[%c0_29, %c0_30, %c0_31], %48 {strides = array<i32>} : memref<1x16x256xbf16, #tpu.memory_space<vmem>>, vector<1x16x256xbf16>,
    return
  }
  func.func @transform_0(%arg0: i32) -> (i32, i32, i32) {
    %c0_i32 = arith.constant 0 : i32
    %c0_i32_0 = arith.constant 0 : i32
    %c0_i32_1 = arith.constant 0 : i32
    return %arg0, %c0_i32, %c0_i32_0 : i32, i32, i32
  }
  func.func @transform_1(%arg0: i32) -> (i32, i32) {
    %c0_i32 = arith.constant 0 : i32
    %c0_i32_0 = arith.constant 0 : i32
    %c0_i32_1 = arith.constant 0 : i32
    return %c0_i32, %c0_i32_0 : i32, i32
  }
  func.func @transform_2(%arg0: i32) -> (i32, i32) {
    %c0_i32 = arith.constant 0 : i32
    %c0_i32_0 = arith.constant 0 : i32
    %c0_i32_1 = arith.constant 0 : i32
    return %c0_i32, %c0_i32_0 : i32, i32
  }
  func.func @transform_3(%arg0: i32) -> (i32, i32) {
    %c0_i32 = arith.constant 0 : i32
    %c0_i32_0 = arith.constant 0 : i32
    %c0_i32_1 = arith.constant 0 : i32
    return %c0_i32, %c0_i32_0 : i32, i32
  }
  func.func @transform_4(%arg0: i32) -> (i32, i32) {
    %c0_i32 = arith.constant 0 : i32
    %c0_i32_0 = arith.constant 0 : i32
    %c0_i32_1 = arith.constant 0 : i32
    return %c0_i32, %c0_i32_0 : i32, i32
  }
  func.func @transform_5(%arg0: i32) -> (i32, i32) {
    %c0_i32 = arith.constant 0 : i32
    %c0_i32_0 = arith.constant 0 : i32
    %c0_i32_1 = arith.constant 0 : i32
    return %c0_i32, %c0_i32_0 : i32, i32
  }
  func.func @transform_6(%arg0: i32) -> (i32, i32) {
    %c0_i32 = arith.constant 0 : i32
    %c0_i32_0 = arith.constant 0 : i32
    %c0_i32_1 = arith.constant 0 : i32
    return %c0_i32, %c0_i32_0 : i32, i32
  }
  func.func @transform_7(%arg0: i32) -> (i32, i32, i32) {
    %c0_i32 = arith.constant 0 : i32
    %c0_i32_0 = arith.constant 0 : i32
    %c0_i32_1 = arith.constant 0 : i32
    return %arg0, %c0_i32, %c0_i32_0 : i32, i32, i32
  }
  func.func @transform_8(%arg0: i32) -> (i32, i32, i32) {
    %c0_i32 = arith.constant 0 : i32
    %c0_i32_0 = arith.constant 0 : i32
    %c0_i32_1 = arith.constant 0 : i32
    return %arg0, %c0_i32, %c0_i32_0 : i32, i32, i32
  }
  func.func @transform_9(%arg0: i32) -> (i32, i32, i32) {
    %c0_i32 = arith.constant 0 : i32
    %c0_i32_0 = arith.constant 0 : i32
    %c0_i32_1 = arith.constant 0 : i32
    return %arg0, %c0_i32, %c0_i32_0 : i32, i32, i32
  }
  func.func @transform_10(%arg0: i32) -> (i32, i32, i32) {
    %c0_i32 = arith.constant 0 : i32
    %c0_i32_0 = arith.constant 0 : i32
    %c0_i32_1 = arith.constant 0 : i32
    return %arg0, %c0_i32, %c0_i32_0 : i32, i32, i32
  }
}

</mosaic_0001>

<bundles_post_ra>
// kernel: tpu_custom_call.1
= control target key start
LH: loop header
LB: loop body
LE: loop exit
PB: predicated region body
PF: predicated region fallthrough
CT: control target
= control target key end

     0   :  { %s1766_s0 = inlined_call_operand.hbm [shape: f32[2,16,256], index: 0, kind: input, shape index: {}]   ;;  %s1767_s1 = inlined_call_operand.vmem [shape: bf16[16,16], index: 1, kind: input, shape index: {}]   ;;  %s1768_s2 = inlined_call_operand.vmem [shape: bf16[16,16], index: 2, kind: input, shape index: {}]   ;;  %s1769_s3 = inlined_call_operand.vmem [shape: bf16[16,16], index: 3, kind: input, shape index: {}]   ;;  %s1770_s4 = inlined_call_operand.vmem [shape: f32[16,1], index: 4, kind: input, shape index: {}]   ;;  %s1771_s5 = inlined_call_operand.vmem [shape: f32[16,1], index: 5, kind: input, shape index: {}]   ;;  %s1772_s6 = inlined_call_operand.vmem [shape: f32[16,1], index: 6, kind: input, shape index: {}]   ;;  %s1773_s7 = inlined_call_operand.hbm [shape: bf16[2,16,16], index: 7, kind: output, shape index: {0}]   ;;  %s1774_s8 = inlined_call_operand.vmem [shape: bf16[2,256,16], index: 8, kind: output, shape index: {1}]   ;;  %s1775_s9 = inlined_call_operand.hbm [shape: bf16[2,16,256], index: 9, kind: output, shape index: {2}]   ;;  %s1776_s10 = inlined_call_operand.hbm [shape: bf16[2,16,256], index: 10, kind: output, shape index: {3}]  }
   0x1   :  { %1782 = sst [smem:[#allocation16_spill]] %s1766_s0 }
   0x2   :  { %1783 = sst [smem:[#allocation17_spill]] %s1767_s1 }
   0x3   :  { %1784 = sst [smem:[#allocation18_spill]] %s1768_s2 }
   0x4   :  { %1785 = sst [smem:[#allocation19_spill]] %s1769_s3 }
   0x5   :  { %1786 = sst [smem:[#allocation20_spill]] %s1770_s4 }
   0x6   :  { %16 = vsyncpa [#allocation3], 0 }
   0x7   :  { %18 = vsyncpa [#allocation3 + $0x1], 0 }
   0x8   :  { %19 = vsyncpa [#allocation4], 0 }
   0x9   :  { %21 = vsyncpa [#allocation4 + $0x1], 0 }
   0xa   :  { %22 = vsyncpa [#allocation7], 0 }
   0xb   :  { %24 = vsyncpa [#allocation7 + $0x1], 0  ;;  %s1450_s13 = smov 0   ;;  %s1452_s14 = smov 0  }
   0xc   :  { %s1454_s15 = smov 0   ;;  %s1456_s16 = smov 0  }
   0xd LB: > { %1787 = sst [smem:[#allocation12_spill]] %s1382_s15  ;;  %s1471_s17 = sadd.s32 4294967295, %s1386_s16   ;;  %s1386_s16 = sphi %s1456_s16, %s1804_s16   ;;  %s1382_s15 = sphi %s1454_s15, %s1806_s15   ;;  %s1378_s14 = sphi %s1452_s14, %s1808_s14   ;;  %s1374_s13 = sphi %s1450_s13, %s1807_s13  }
   0xe   : > { %s1777_s18 = sadd.s32 4294967294, %s1386_s16   ;;  %s1475_s19 = sadd.s32 1, %s1386_s16  }
   0xf   : > { %1788 = sst [smem:[#allocation13_spill]] %s1475_s19  ;;  %s37_s20 = sadd.s32 1, %s1382_s15 }
  0x10   : > { %s34_s21 = ssub.s32 %s1386_s16, %s1475_s19  ;;  %p44_p0 = scmp.ne.s32.totalorder %s1382_s15, %s1378_s14 }
  0x11   : > { %p35_p1 = scmp.eq.s32.totalorder %s34_s21, 0  ;;  %p45_p2 = scmp.eq.s32.totalorder %s1386_s16, 0 }
  0x12   : > { %p50_p3 = scmp.ne.s32.totalorder %s1378_s14, %s1374_s13  ;;  %p51_p4 = scmp.eq.s32.totalorder %s1471_s17, 0 }
  0x13   : > { %s1487_s22 = scalar_select %p35_p1, %s1382_s15, %s37_s20  }
  0x14   : > { %p1489_p5 = por %p45_p2, %p44_p0  ;;  %p1493_p6 = por %p51_p4, %p50_p3 }
  0x15   : > { %1789 = sst [smem:[#allocation14_spill]] %s1487_s22  ;;  %p200_p7 = scmp.eq.s32.totalorder %s1471_s17, 1 }
  0x16   : > { %p206_p8 = scmp.eq.s32.totalorder %s1777_s18, 1  ;;  %p1094_p10 = scmp.lt.s32.totalorder %s1386_s16, 2 }
  0x17   : > { %p1502_p11 = por %p200_p7, %p44_p0  ;;  %s322_s27 = sand.u32 1, %s1382_s15  }
  0x18   : > { %p1506_p12 = por %p206_p8, %p50_p3  ;;  %s1064_s28 = sshll.u32 %s1386_s16, 5 }
  0x19   : > { %s1025_s29 = sshll.u32 %s322_s27, 5  ;;  %s1795_s0 = sld [smem:[#allocation16_spill]] }
  0x1a   : > { %s1793_s26 = scalar_select %p1506_p12, 1, 0 }
  0x1b   : > { %s326_s21 = scalar_lea.vmem [#allocation2], %s1025_s29  ;;  %p1517_p13 = pnand %p1094_p10, %p1489_p5 }
  0x1c   : > { %1794 = sst [smem:[#allocation15_spill]] %s1793_s26  ;;  %s334_s18 = sshll.u32 %s326_s21, 4  ;;  %s335_s18 = int_to_ptr.vmem [resolvable:$true] %s334_s18 }
  0x1d   : > { %p1028_p0 = scmp.ge.s32.totalorder %s1386_s16, 1  ;;  %p342_p1 = scmp.lt.s32.totalorder %s1386_s16, 3 }
  0x1e   : > { %s323_s15 = scalar_lea.sflag [#allocation3], %s322_s27  ;;  %p1234_p3 = pneg %p1517_p13 }
  0x1f   : > { %s331_s12 = scalar_lea.hbm %s1795_s0, %s1064_s28  ;;  %s1237_s23 = scalar_lea.hbm %s1795_s0, 64 }
  0x20   : > { %s332_s20 = sshll.u32 %s331_s12, 4  ;;  %s333_s20 = int_to_ptr.hbm [resolvable:$true] %s332_s20 }
  0x21   : > { %s1230_s19 = sshra.s32 %s333_s20, 4  ;;  %s1231_s19 = int_to_ptr.hbm [resolvable:$true] %s1230_s19 }
  0x22   : > { %s1232_s26 = scalar_lea.hbm %s1231_s19, 32  ;;  %p1238_p5 = scmp.lt.s32.totalorder %s1231_s19, %s1795_s0 }
  0x23   : > { %p1233_p2 = scmp.ne.s32.totalorder %s1231_s19, %s1232_s26  ;;  %p1239_p8 = scmp.lt.s32.totalorder %s1237_s23, %s1232_s26 }
  0x25   : > { %p1235_p4 = pnand %p1234_p3, %p1233_p2  ;;  %p1240_p10 = por %p1239_p8, %p1238_p5 }
  0x27   : > { %p1236_p7 = pneg %p1235_p4 }
  0x29   : > { %p1241_p9 = pnand %p1240_p10, %p1236_p7 }
  0x2b   : > { %1244 = shalt.err (!%p1241_p9)
}
  0x2c   : > { %s1388_s27 = smov 256   ;;  %s1389_s12 = smov 16  }
  0x2d   : > { %1083 = dma.hbm_to_vmem [thread:$0]  (!%p1517_p13), %s333_s20, 512, %s335_s18, %s323_s15, %s1388_s27, %s1388_s27, %s1389_s12  }
  0x2e   : > { %p343_p2 = pnand %p1028_p0, %p342_p1 }
  0x2f   : > { %s1538_s21 = sand.u32 (!%p343_p2), 1, %s1378_s14  }
  0x30   : > { %346 = sbr.rel (%p343_p2) target bundleno = 775 (0x307), region = 48  ;;  %s1029_s19 = sshll.u32 (!%p343_p2), %s1538_s21, 5 }
  0x31   : > { %s349_s26 = scalar_lea.sflag (!%p343_p2), [#allocation3], %s1538_s21  ;;  %s352_s28 = scalar_lea.vmem (!%p343_p2), [#allocation2], %s1029_s19 }
  0x35   : > { %1361 = dma.done.wait (%p1493_p6), %s349_s26, 512  }
  0x36   : > { %1363 = vsyncadd (%p1493_p6), %s349_s26, 4294966784  ;;  %v411_v0 = vld [vmem:[%s352_s28] sm:$0xff]  ;;  %v413_v1 = vld [vmem:[%s352_s28 + $0x10] sm:$0xff]  ;;  %vm445_vm0 = vcmask 130048   ;;  %s1797_s1 = sld [smem:[#allocation17_spill]]  ;;  %v1390_v15 = vmov 0  }
  0x37   : > { %v412_v2 = vld [vmem:[%s352_s28 + $0x8] sm:$0xff]  ;;  %v415_v3 = vpack.c.bf16 %v413_v1, %v411_v0  ;;  %v414_v4 = vld [vmem:[%s352_s28 + $0x18] sm:$0xff]  ;;  %1137 = vset.pattern.permute.xlu1 %v1390_v15  ;;  %1136 = vset.pattern.permute.xlu0 %v1390_v15  ;;  %s1798_s2 = sld [smem:[#allocation18_spill]]  ;;  %v741_v25 = vld [vmem:[%s1772_s6] sm:$0xff]  ;;  %s1031_s20 = sshll.u32 %s1538_s21, 4  ;;  %vm504_vm5 = vcmask 125952  }
  0x38   : > { %v416_v5 = vpack.c.bf16 %v414_v4, %v412_v2  ;;  %s1799_s3 = sld [smem:[#allocation19_spill]]  ;;  %v687_v27 = vld [vmem:[%s1771_s5] sm:$0xff]  ;;  %v688_v28 = vld [vmem:[%s1771_s5 + $0x8] sm:$0xff]  ;;  %s1592_s29 = scalar_lea.vmem [#allocation8], %s1031_s20 }
  0x39   : > { %424 = vmatpush.bf16.xpose.msra.mxu0 %v415_v3  ;;  %536 = vmatpush.bf16.msra.mxu2 %v415_v3  ;;  %s1800_s4 = sld [smem:[#allocation20_spill]]  ;;  %v742_v29 = vld [vmem:[%s1772_s6 + $0x8] sm:$0xff]  ;;  %s1595_s23 = scalar_lea.vmem [#allocation6], %s1031_s20 }
  0x3a   : > { %438 = vmatpush.bf16.xpose.msra.mxu1 %v416_v5  ;;  %550 = vmatpush.bf16.msra.mxu3 %v416_v5  ;;  %s1030_s30 = sshll.u32 %s1538_s21, 3  ;;  %p405_p6 = scmp.lt.s32.totalorder %s1471_s17, 1 }
  0x3b   : > { %s1602_s11 = scalar_lea.vmem [#allocation5], %s1030_s30  ;;  %s841_s27 = sshll.u32 %s1595_s23, 4  ;;  %s842_s27 = int_to_ptr.vmem [resolvable:$true] %s841_s27 }
  0x3c   : > { %v1066_v14 = vld [vmem:[%s1797_s1] sm:$0xff]  ;;  %s1612_s12 = scalar_select %p405_p6, %s1471_s17, 1 }
  0x3d   : > { %714 = vmatpush.bf16.msrb.mxu2 %v415_v3  ;;  %1040 = vmatmul.msk.bf16.vlgmr.msra.gmra.mxu3 %vm445_vm0, %v1066_v14  ;;  %v1067_v16 = vld [vmem:[%s1798_s2] sm:$0xff]  ;;  %s1070_s26 = sshll.u32 %s1471_s17, 4  ;;  %s1069_s22 = sshll.u32 %s1471_s17, 3 }
  0x3e   : > { %728 = vmatpush.bf16.msrb.mxu3 %v416_v5  ;;  %1039 = vmatmul.msk.bf16.vlgmr.msra.gmra.mxu2 %vm445_vm0, %v1066_v14  ;;  %v1068_v20 = vld [vmem:[%s1799_s3] sm:$0xff]  ;;  %s1065_s19 = sshll.u32 %s1612_s12, 7  ;;  %s840_s18 = scalar_lea.hbm %s1775_s9, %s1070_s26 }
  0x3f   : > { %v509_v21 = vld [vmem:[%s1800_s4] sm:$0xff]  ;;  %v510_v26 = vld [vmem:[%s1800_s4 + $0x8] sm:$0xff]  ;;  %s803_s24 = sand.u32 1, %s1471_s17   ;;  %s843_s20 = sshll.u32 %s840_s18, 4  ;;  %s844_s20 = int_to_ptr.hbm [resolvable:$true] %s843_s20 }
  0x40   : > { %425 = vmatmul.bf16.vlgmr.msra.gmra.mxu0 %v415_v3  ;;  %s1621_s30 = scalar_lea.sflag [#allocation7], %s803_s24  ;;  %s1274_s0 = sshra.s32 %s844_s20, 4  ;;  %s1275_s0 = int_to_ptr.hbm [resolvable:$true] %s1274_s0 }
  0x41   : > { %768 = vmatpush.bf16.msrb.mxu0 %v415_v3  ;;  %439 = vmatmul.bf16.vlgmr.msra.gmra.mxu1 %v416_v5  ;;  %s1276_s1 = scalar_lea.hbm %s1275_s0, 16  ;;  %s1280_s2 = scalar_lea.hbm %s1775_s9, 32 }
  0x42   : > { %782 = vmatpush.bf16.msrb.mxu1 %v416_v5  ;;  %p1277_p9 = scmp.ne.s32.totalorder %s1275_s0, %s1276_s1  ;;  %p1281_p1 = scmp.lt.s32.totalorder %s1275_s0, %s1775_s9 }
  0x43   : > { %p1282_p3 = scmp.lt.s32.totalorder %s1280_s2, %s1276_s1 }
  0x44   : > { %p1278_p13 = pnand %p1277_p9, %p1502_p11 }
  0x45   : > { %p1283_p4 = por %p1282_p3, %p1281_p1 }
  0x46   : > { %p1279_p0 = pneg %p1278_p13 }
  0x48   : > { %p1284_p7 = pnand %p1283_p4, %p1279_p0 }
  0x4d   : > { %1046 = vmatmul.msk.bf16.vlgmr.msrb.gmra.mxu3 %vm445_vm0, %v1067_v16 }
  0x4e   : > { %1045 = vmatmul.msk.bf16.vlgmr.msrb.gmra.mxu2 %vm445_vm0, %v1067_v16 }
  0x50   : > { %1051 = vmatmul.msk.bf16.vlgmr.msrb.gmra.mxu0 %vm445_vm0, %v1068_v20 }
  0x51   : > { %1052 = vmatmul.msk.bf16.vlgmr.msrb.gmra.mxu1 %vm445_vm0, %v1068_v20 }
  0xbd   : > { %v426_v6 = vpop.f32.mrf.mxu0 }
  0xbe   : > { %v440_v7 = vpop.f32.mrf.mxu1 }
  0xbf   : > { %v441_v8 = vadd.f32 %v440_v7, %v426_v6 }
  0xc0   : > { %v552_v42 = vpop.f32.mrf.mxu3 }
  0xc1   : > { %v446_v9 = vsel %vm445_vm0, %v441_v8, -inf  ;;  %v538_v41 = vpop.f32.mrf.mxu2 }
  0xc2   : > { %447 = vmax.xlane.f32.xlu0 %v446_v9 }
  0xc5   : > { %v428_v10 = vpop.f32.mrf.mxu0 }
  0xc6   : > { %v442_v11 = vpop.f32.mrf.mxu1 }
  0xc7   : > { %v443_v12 = vadd.f32 %v442_v11, %v428_v10 }
  0xc8   : > { %v554_v50 = vpop.f32.mrf.mxu3 }
  0xc9   : > { %v449_v13 = vsel %vm445_vm0, %v443_v12, -inf  ;;  %v540_v49 = vpop.f32.mrf.mxu2 }
  0xca   : > { %450 = vmax.xlane.f32.xlu0 %v449_v13 }
  0xcd   : > { %v770_v39 = vpop.f32.mrf.mxu0 }
  0xce   : > { %v784_v40 = vpop.f32.mrf.mxu1 }
  0xd0   : > { %v730_v53 = vpop.f32.mrf.mxu3 }
  0xd1   : > { %v716_v52 = vpop.f32.mrf.mxu2 }
  0xd5   : > { %v772_v2 = vpop.f32.mrf.mxu0 }
  0xd6   : > { %v786_v3 = vpop.f32.mrf.mxu1 }
  0xd8   : > { %v732_v59 = vpop.f32.mrf.mxu3 }
  0xd9   : > { %v718_v58 = vpop.f32.mrf.mxu2 }
  0xde   : > { %513 = vperm.xlu0 %1136, %v509_v21  }
  0xe6   : > { %745 = vperm.xlu0 %1136, %v741_v25  }
 0x135   : > { %v448_v17 = vpop.xlane.xlu0 %447 }
 0x136   : > { %v452_v18 = vsub.f32 %v448_v17, %v441_v8 }
 0x138   : > { %v454_v19 = vsel %vm445_vm0, %v452_v18, -inf }
 0x139   : > { %455 = vmax.xlane.f32.xlu1 %v454_v19 }
 0x13d   : > { %v451_v22 = vpop.xlane.xlu0 %450 }
 0x13e   : > { %v453_v23 = vsub.f32 %v451_v22, %v443_v12 }
 0x140   : > { %v457_v24 = vsel %vm445_vm0, %v453_v23, -inf }
 0x141   : > { %458 = vmax.xlane.f32.xlu1 %v457_v24 }
 0x150   : > { %v514_v34 = vpop.permute.xlu0 %513 }
 0x151   : > { %v539_v0 = vadd.f32 %v538_v41, %v514_v34  ;;  %v553_v1 = vadd.f32 %v552_v42, %v514_v34 }
 0x153   : > { %v1138_v7 = vpack.i.bf16 %v553_v1, %v539_v0 }
 0x158   : > { %v746_v43 = vpop.permute.xlu0 %745 }
 0x159   : > { %v771_v44 = vadd.f32 %v770_v39, %v746_v43  ;;  %v785_v45 = vadd.f32 %v784_v40, %v746_v43 }
 0x15a   : > { %518 = vperm.xlu1 %1137, %v510_v26  }
 0x15b   : > { %v789_v47 = vpack.c.bf16 %v785_v45, %v771_v44 }
 0x15d   : > { %791 = vst [vmem:[%s1592_s29] sm:$0xff] %v789_v47 }
 0x162   : > { %691 = vperm.xlu1 %1137, %v687_v27  }
 0x16a   : > { %696 = vperm.xlu1 %1137, %v688_v28  }
 0x172   : > { %750 = vperm.xlu1 %1137, %v742_v29  }
 0x1ac   : > { %v456_v30 = vpop.xlane.xlu1 %455 }
 0x1ad   : > { %v460_v31 = vsub.f32 %v452_v18, %v456_v30 }
 0x1af   : > { %v462_v32 = vmul.f32 1.442695, %v460_v31 }
 0x1b1   : > { %1222 = vpow2.f32 %v462_v32 }
 0x1b4   : > { %v459_v33 = vpop.xlane.xlu1 %458 }
 0x1b5   : > { %v461_v35 = vsub.f32 %v453_v23, %v459_v33 }
 0x1b7   : > { %v1583_v36 = vpop.eup %1222  ;;  %v464_v37 = vmul.f32 1.442695, %v461_v35 }
 0x1b8   : > { %v466_v38 = vsel %vm445_vm0, %v1583_v36, 0.0 }
 0x1b9   : > { %1224 = vpow2.f32 %v464_v37  ;;  %467 = vadd.xlane.f32.xlu2 %v466_v38 }
 0x1bf   : > { %v1588_v46 = vpop.eup %1224 }
 0x1c0   : > { %v469_v48 = vsel %vm445_vm0, %v1588_v46, 0.0 }
 0x1c1   : > { %470 = vadd.xlane.f32.xlu2 %v469_v48 }
 0x1cc   : > { %v519_v51 = vpop.permute.xlu1 %518 }
 0x1cd   : > { %v541_v9 = vadd.f32 %v540_v49, %v519_v51  ;;  %v555_v10 = vadd.f32 %v554_v50, %v519_v51 }
 0x1cf   : > { %v1140_v11 = vpack.i.bf16 %v555_v10, %v541_v9 }
 0x1d4   : > { %v692_v54 = vpop.permute.xlu1 %691 }
 0x1d5   : > { %v717_v55 = vadd.f32 %v716_v52, %v692_v54  ;;  %v731_v56 = vadd.f32 %v730_v53, %v692_v54 }
 0x1d7   : > { %v735_v57 = vpack.c.bf16 %v731_v56, %v717_v55 }
 0x1d9   : > { %737 = vst [vmem:[%s1595_s23] sm:$0xff] %v735_v57 }
 0x1dc   : > { %v697_v60 = vpop.permute.xlu1 %696 }
 0x1dd   : > { %v719_v61 = vadd.f32 %v718_v58, %v697_v60  ;;  %v733_v62 = vadd.f32 %v732_v59, %v697_v60 }
 0x1df   : > { %v736_v63 = vpack.c.bf16 %v733_v62, %v719_v61 }
 0x1e1   : > { %738 = vst [vmem:[%s1595_s23 + $0x8] sm:$0xff] %v736_v63 }
 0x1e4   : > { %v751_v4 = vpop.permute.xlu1 %750 }
 0x1e5   : > { %v773_v5 = vadd.f32 %v772_v2, %v751_v4  ;;  %v787_v6 = vadd.f32 %v786_v3, %v751_v4 }
 0x1e7   : > { %v790_v8 = vpack.c.bf16 %v787_v6, %v773_v5 }
 0x1e9   : > { %792 = vst [vmem:[%s1592_s29 + $0x8] sm:$0xff] %v790_v8 }
 0x1ea   : > { %1139 = vxpose.xlu2.b32.start [1/2] (short) %v1138_v7, 128 }
 0x1f2   : > { %1141 = vxpose.xlu2.b32.end [2/2] (short) %v1140_v11, 128 }
 0x22c   : > { %v468_v12 = vpop.xlane.xlu2 %467 }
 0x22d   : > { %1226 = vrcp.f32 %v468_v12  ;;  %v483_v17 = vand.u32 2147483648, %v468_v12  ;;  %v481_v19 = vand.u32 2147483647, %v468_v12  ;;  %vm477_vm2 = vweird.f32 %v468_v12 }
 0x22f   : > { %v484_v22 = vor.u32 1.1754944e-38, %v483_v17  ;;  %vm482_vm4 = vcmp.eq.f32.partialorder %v481_v19, 8.507059e+37 }
 0x233   : > { %v1227_v13 = vpop.eup %1226 }
 0x234   : > { %v473_v14 = vmul.f32 %v1227_v13, %v468_v12  ;;  %v471_v15 = vpop.xlane.xlu2 %470  ;;  %vm478_vm1 = vweird.f32 %v1227_v13 }
 0x235   : > { %1228 = vrcp.f32 %v471_v15  ;;  %vm479_vm3 = vmor %vm477_vm2, %vm478_vm1  ;;  %v498_v28 = vand.u32 2147483648, %v471_v15  ;;  %v496_v31 = vand.u32 2147483647, %v471_v15  ;;  %vm492_vm7 = vweird.f32 %v471_v15 }
 0x236   : > { %v474_v16 = vsub.f32 1.0, %v473_v14 }
 0x237   : > { %v499_v33 = vor.u32 1.1754944e-38, %v498_v28  ;;  %vm497_vm9 = vcmp.eq.f32.partialorder %v496_v31, 8.507059e+37 }
 0x238   : > { %v475_v18 = vmul.f32 %v1227_v13, %v474_v16 }
 0x23a   : > { %v476_v20 = vadd.f32 %v1227_v13, %v475_v18 }
 0x23b   : > { %v1229_v21 = vpop.eup %1228 }
 0x23c   : > { %v480_v23 = vsel %vm479_vm3, %v1227_v13, %v476_v20  ;;  %v488_v24 = vmul.f32 %v1229_v21, %v471_v15  ;;  %vm493_vm6 = vweird.f32 %v1229_v21 }
 0x23d   : > { %v485_v25 = vsel %vm482_vm4, %v484_v22, %v480_v23  ;;  %vm494_vm8 = vmor %vm492_vm7, %vm493_vm6 }
 0x23e   : > { %v486_v26 = vmul.f32 %v1583_v36, %v485_v25  ;;  %v489_v27 = vsub.f32 1.0, %v488_v24 }
 0x240   : > { %v502_v29 = vpack.c.bf16 %v486_v26, %v486_v26  ;;  %v490_v30 = vmul.f32 %v1229_v21, %v489_v27 }
 0x242   : > { %v491_v32 = vadd.f32 %v1229_v21, %v490_v30  ;;  %505 = vst.msk [vmem:[%s1602_s11] sm:$0xf] %vm504_vm5, %v502_v29 }
 0x244   : > { %v495_v34 = vsel %vm494_vm8, %v1229_v21, %v491_v32 }
 0x245   : > { %v500_v35 = vsel %vm497_vm9, %v499_v33, %v495_v34 }
 0x246   : > { %v501_v36 = vmul.f32 %v1588_v46, %v500_v35 }
 0x248   : > { %v503_v37 = vpack.c.bf16 %v501_v36, %v501_v36 }
 0x24a   : > { %506 = vst.msk [vmem:[%s1602_s11 + $0x4] sm:$0xf] %vm504_vm5, %v503_v37 }
 0x24b   : > { %1287 = shalt.err (!%p1284_p7)
}
 0x24c   : > { %s1391_s17 = smov 128   ;;  %s1392_s15 = smov 8  }
 0x24d   : > { %1075 = dma.vmem_to_hbm [thread:$0]  (%p1502_p11), %s842_s27, 256, %s844_s20, %s1621_s30, %s1391_s17, %s1391_s17, %s1392_s15  }
 0x24e   : > { %s858_s18 = sshll.u32 %s1592_s29, 4  ;;  %s857_s0 = scalar_lea.hbm %s1776_s10, %s1070_s26  ;;  %s1650_s18 = int_to_ptr.vmem [resolvable:$true] %s858_s18 }
 0x24f   : > { %s1644_s3 = scalar_lea.vmem %s1774_s8, %s1065_s19  ;;  %s820_s4 = scalar_lea.hbm %s1773_s7, %s1069_s22 }
 0x250   : > { %s821_s29 = sshll.u32 %s1602_s11, 4  ;;  %s860_s27 = sshll.u32 %s857_s0, 4  ;;  %s822_s29 = int_to_ptr.vmem [resolvable:$true] %s821_s29  ;;  %s1654_s27 = int_to_ptr.hbm [resolvable:$true] %s860_s27 }
 0x251   : > { %s823_s20 = sshll.u32 %s820_s4, 4  ;;  %s794_s19 = scalar_lea.sflag [#allocation4], %s1538_s21  ;;  %s824_s20 = int_to_ptr.hbm [resolvable:$true] %s823_s20 }
 0x252   : > { %s1302_s26 = sshra.s32 %s824_s20, 4  ;;  %s1308_s24 = scalar_lea.hbm %s1773_s7, 16  ;;  %s1303_s26 = int_to_ptr.hbm [resolvable:$true] %s1302_s26 }
 0x253   : > { %s1304_s22 = scalar_lea.hbm %s1303_s26, 8  ;;  %p1309_p2 = scmp.lt.s32.totalorder %s1303_s26, %s1773_s7 }
 0x254   : > { %p1305_p5 = scmp.ne.s32.totalorder %s1303_s26, %s1304_s22  ;;  %p1310_p6 = scmp.lt.s32.totalorder %s1308_s24, %s1304_s22 }
 0x256   : > { %p1306_p8 = pnand %p1305_p5, %p1502_p11  ;;  %p1311_p9 = por %p1310_p6, %p1309_p2 }
 0x258   : > { %p1307_p10 = pneg %p1306_p8 }
 0x25a   : > { %p1312_p13 = pnand %p1311_p9, %p1307_p10 }
 0x283   : > { %v1142_v38 = vpop.trf.xlu2 }
 0x284   : > { %v1146_v39 = vunpack.i.h.bf16 %v1142_v38  ;;  %v1143_v40 = vunpack.i.l.bf16 %v1142_v38 }
 0x286   : > { %v637_v41 = vpack.c.bf16 %v1146_v39, %v1146_v39  ;;  %v621_v42 = vpack.c.bf16 %v1143_v40, %v1143_v40 }
 0x288   : > { %669 = vst.msk [vmem:[%s1644_s3 + $0x40] sm:$0xf] %vm504_vm5, %v637_v41 }
 0x289   : > { %653 = vst.msk [vmem:[%s1644_s3] sm:$0xf] %vm504_vm5, %v621_v42 }
 0x28a   : > { %1315 = shalt.err (!%p1312_p13)
}
 0x28b   : > { %s1393_s21 = smov 64   ;;  %s1394_s1 = smov 4   ;;  %v1147_v43 = vpop.trf.xlu2 }
 0x28c   : > { %1074 = dma.vmem_to_hbm [thread:$0]  (%p1502_p11), %s822_s29, 128, %s824_s20, %s794_s19, %s1393_s21, %s1393_s21, %s1394_s1  }
 0x28d   : > { %s1330_s2 = sshra.s32 %s1654_s27, 4  ;;  %s1336_s22 = scalar_lea.hbm %s1776_s10, 32  ;;  %s1331_s2 = int_to_ptr.hbm [resolvable:$true] %s1330_s2 }
 0x28e   : > { %s1332_s12 = scalar_lea.hbm %s1331_s2, 16  ;;  %p1337_p4 = scmp.lt.s32.totalorder %s1331_s2, %s1776_s10 }
 0x28f   : > { %p1333_p0 = scmp.ne.s32.totalorder %s1331_s2, %s1332_s12  ;;  %p1338_p7 = scmp.lt.s32.totalorder %s1336_s22, %s1332_s12 }
 0x291   : > { %p1334_p1 = pnand %p1333_p0, %p1502_p11  ;;  %p1339_p5 = por %p1338_p7, %p1337_p4 }
 0x293   : > { %p1335_p3 = pneg %p1334_p1 }
 0x295   : > { %p1340_p8 = pnand %p1339_p5, %p1335_p3 }
 0x297   : > { %1343 = shalt.err (!%p1340_p8)
}
 0x298   : > { %1076 = dma.vmem_to_hbm [thread:$0]  (%p1502_p11), %s1650_s18, 256, %s1654_s27, %s1621_s30, %s1391_s17, %s1391_s17, %s1392_s15   ;;  %v1151_v44 = vunpack.i.h.bf16 %v1147_v43  ;;  %v1148_v45 = vunpack.i.l.bf16 %v1147_v43  ;;  %v1152_v48 = vpop.trf.xlu2 }
 0x299   : > { %v1156_v49 = vunpack.i.h.bf16 %v1152_v48  ;;  %v1153_v50 = vunpack.i.l.bf16 %v1152_v48 }
 0x29a   : > { %v638_v46 = vpack.c.bf16 %v1151_v44, %v1151_v44  ;;  %v622_v47 = vpack.c.bf16 %v1148_v45, %v1148_v45 }
 0x29b   : > { %v639_v51 = vpack.c.bf16 %v1156_v49, %v1156_v49  ;;  %v623_v52 = vpack.c.bf16 %v1153_v50, %v1153_v50 }
 0x29c   : > { %670 = vst.msk [vmem:[%s1644_s3 + $0x44] sm:$0xf] %vm504_vm5, %v638_v46 }
 0x29d   : > { %654 = vst.msk [vmem:[%s1644_s3 + $0x4] sm:$0xf] %vm504_vm5, %v622_v47 }
 0x29e   : > { %671 = vst.msk [vmem:[%s1644_s3 + $0x48] sm:$0xf] %vm504_vm5, %v639_v51 }
 0x29f   : > { %655 = vst.msk [vmem:[%s1644_s3 + $0x8] sm:$0xf] %vm504_vm5, %v623_v52 }
 0x2a0   : > { %v1157_v53 = vpop.trf.xlu2 }
 0x2a1   : > { %v1161_v54 = vunpack.i.h.bf16 %v1157_v53  ;;  %v1158_v55 = vunpack.i.l.bf16 %v1157_v53 }
 0x2a3   : > { %v640_v56 = vpack.c.bf16 %v1161_v54, %v1161_v54  ;;  %v624_v57 = vpack.c.bf16 %v1158_v55, %v1158_v55 }
 0x2a5   : > { %672 = vst.msk [vmem:[%s1644_s3 + $0x4c] sm:$0xf] %vm504_vm5, %v640_v56 }
 0x2a6   : > { %656 = vst.msk [vmem:[%s1644_s3 + $0xc] sm:$0xf] %vm504_vm5, %v624_v57 }
 0x2a8   : > { %v1162_v58 = vpop.trf.xlu2 }
 0x2a9   : > { %v1166_v59 = vunpack.i.h.bf16 %v1162_v58  ;;  %v1163_v60 = vunpack.i.l.bf16 %v1162_v58 }
 0x2ab   : > { %v641_v61 = vpack.c.bf16 %v1166_v59, %v1166_v59  ;;  %v625_v62 = vpack.c.bf16 %v1163_v60, %v1163_v60 }
 0x2ad   : > { %673 = vst.msk [vmem:[%s1644_s3 + $0x50] sm:$0xf] %vm504_vm5, %v641_v61 }
 0x2ae   : > { %657 = vst.msk [vmem:[%s1644_s3 + $0x10] sm:$0xf] %vm504_vm5, %v625_v62 }
 0x2b0   : > { %v1167_v63 = vpop.trf.xlu2 }
 0x2b1   : > { %v1171_v0 = vunpack.i.h.bf16 %v1167_v63  ;;  %v1168_v1 = vunpack.i.l.bf16 %v1167_v63 }
 0x2b3   : > { %v642_v2 = vpack.c.bf16 %v1171_v0, %v1171_v0  ;;  %v626_v3 = vpack.c.bf16 %v1168_v1, %v1168_v1 }
 0x2b5   : > { %674 = vst.msk [vmem:[%s1644_s3 + $0x54] sm:$0xf] %vm504_vm5, %v642_v2 }
 0x2b6   : > { %658 = vst.msk [vmem:[%s1644_s3 + $0x14] sm:$0xf] %vm504_vm5, %v626_v3 }
 0x2b8   : > { %v1172_v4 = vpop.trf.xlu2 }
 0x2b9   : > { %v1176_v5 = vunpack.i.h.bf16 %v1172_v4  ;;  %v1173_v6 = vunpack.i.l.bf16 %v1172_v4 }
 0x2bb   : > { %v643_v7 = vpack.c.bf16 %v1176_v5, %v1176_v5  ;;  %v627_v8 = vpack.c.bf16 %v1173_v6, %v1173_v6 }
 0x2bd   : > { %675 = vst.msk [vmem:[%s1644_s3 + $0x58] sm:$0xf] %vm504_vm5, %v643_v7 }
 0x2be   : > { %659 = vst.msk [vmem:[%s1644_s3 + $0x18] sm:$0xf] %vm504_vm5, %v627_v8 }
 0x2c0   : > { %v1177_v9 = vpop.trf.xlu2 }
 0x2c1   : > { %v1181_v10 = vunpack.i.h.bf16 %v1177_v9  ;;  %v1178_v11 = vunpack.i.l.bf16 %v1177_v9 }
 0x2c3   : > { %v644_v12 = vpack.c.bf16 %v1181_v10, %v1181_v10  ;;  %v628_v13 = vpack.c.bf16 %v1178_v11, %v1178_v11 }
 0x2c5   : > { %676 = vst.msk [vmem:[%s1644_s3 + $0x5c] sm:$0xf] %vm504_vm5, %v644_v12 }
 0x2c6   : > { %660 = vst.msk [vmem:[%s1644_s3 + $0x1c] sm:$0xf] %vm504_vm5, %v628_v13 }
 0x2c8   : > { %v1182_v14 = vpop.trf.xlu2 }
 0x2c9   : > { %v1186_v15 = vunpack.i.h.bf16 %v1182_v14  ;;  %v1183_v16 = vunpack.i.l.bf16 %v1182_v14 }
 0x2cb   : > { %v645_v17 = vpack.c.bf16 %v1186_v15, %v1186_v15  ;;  %v629_v18 = vpack.c.bf16 %v1183_v16, %v1183_v16 }
 0x2cd   : > { %677 = vst.msk [vmem:[%s1644_s3 + $0x60] sm:$0xf] %vm504_vm5, %v645_v17 }
 0x2ce   : > { %661 = vst.msk [vmem:[%s1644_s3 + $0x20] sm:$0xf] %vm504_vm5, %v629_v18 }
 0x2d0   : > { %v1187_v19 = vpop.trf.xlu2 }
 0x2d1   : > { %v1191_v20 = vunpack.i.h.bf16 %v1187_v19  ;;  %v1188_v21 = vunpack.i.l.bf16 %v1187_v19 }
 0x2d3   : > { %v646_v22 = vpack.c.bf16 %v1191_v20, %v1191_v20  ;;  %v630_v23 = vpack.c.bf16 %v1188_v21, %v1188_v21 }
 0x2d5   : > { %678 = vst.msk [vmem:[%s1644_s3 + $0x64] sm:$0xf] %vm504_vm5, %v646_v22 }
 0x2d6   : > { %662 = vst.msk [vmem:[%s1644_s3 + $0x24] sm:$0xf] %vm504_vm5, %v630_v23 }
 0x2d8   : > { %v1192_v24 = vpop.trf.xlu2 }
 0x2d9   : > { %v1196_v25 = vunpack.i.h.bf16 %v1192_v24  ;;  %v1193_v26 = vunpack.i.l.bf16 %v1192_v24 }
 0x2db   : > { %v647_v27 = vpack.c.bf16 %v1196_v25, %v1196_v25  ;;  %v631_v28 = vpack.c.bf16 %v1193_v26, %v1193_v26 }
 0x2dd   : > { %679 = vst.msk [vmem:[%s1644_s3 + $0x68] sm:$0xf] %vm504_vm5, %v647_v27 }
 0x2de   : > { %663 = vst.msk [vmem:[%s1644_s3 + $0x28] sm:$0xf] %vm504_vm5, %v631_v28 }
 0x2e0   : > { %v1197_v29 = vpop.trf.xlu2 }
 0x2e1   : > { %v1201_v30 = vunpack.i.h.bf16 %v1197_v29  ;;  %v1198_v31 = vunpack.i.l.bf16 %v1197_v29 }
 0x2e3   : > { %v648_v32 = vpack.c.bf16 %v1201_v30, %v1201_v30  ;;  %v632_v33 = vpack.c.bf16 %v1198_v31, %v1198_v31 }
 0x2e5   : > { %680 = vst.msk [vmem:[%s1644_s3 + $0x6c] sm:$0xf] %vm504_vm5, %v648_v32 }
 0x2e6   : > { %664 = vst.msk [vmem:[%s1644_s3 + $0x2c] sm:$0xf] %vm504_vm5, %v632_v33 }
 0x2e8   : > { %v1202_v34 = vpop.trf.xlu2 }
 0x2e9   : > { %v1206_v35 = vunpack.i.h.bf16 %v1202_v34  ;;  %v1203_v36 = vunpack.i.l.bf16 %v1202_v34 }
 0x2eb   : > { %v649_v37 = vpack.c.bf16 %v1206_v35, %v1206_v35  ;;  %v633_v38 = vpack.c.bf16 %v1203_v36, %v1203_v36 }
 0x2ed   : > { %681 = vst.msk [vmem:[%s1644_s3 + $0x70] sm:$0xf] %vm504_vm5, %v649_v37 }
 0x2ee   : > { %665 = vst.msk [vmem:[%s1644_s3 + $0x30] sm:$0xf] %vm504_vm5, %v633_v38 }
 0x2f0   : > { %v1207_v39 = vpop.trf.xlu2 }
 0x2f1   : > { %v1211_v40 = vunpack.i.h.bf16 %v1207_v39  ;;  %v1208_v41 = vunpack.i.l.bf16 %v1207_v39 }
 0x2f3   : > { %v650_v42 = vpack.c.bf16 %v1211_v40, %v1211_v40  ;;  %v634_v43 = vpack.c.bf16 %v1208_v41, %v1208_v41 }
 0x2f5   : > { %682 = vst.msk [vmem:[%s1644_s3 + $0x74] sm:$0xf] %vm504_vm5, %v650_v42 }
 0x2f6   : > { %666 = vst.msk [vmem:[%s1644_s3 + $0x34] sm:$0xf] %vm504_vm5, %v634_v43 }
 0x2f8   : > { %v1212_v44 = vpop.trf.xlu2 }
 0x2f9   : > { %v1216_v45 = vunpack.i.h.bf16 %v1212_v44  ;;  %v1213_v46 = vunpack.i.l.bf16 %v1212_v44 }
 0x2fb   : > { %v651_v47 = vpack.c.bf16 %v1216_v45, %v1216_v45  ;;  %v635_v48 = vpack.c.bf16 %v1213_v46, %v1213_v46 }
 0x2fd   : > { %683 = vst.msk [vmem:[%s1644_s3 + $0x78] sm:$0xf] %vm504_vm5, %v651_v47 }
 0x2fe   : > { %667 = vst.msk [vmem:[%s1644_s3 + $0x38] sm:$0xf] %vm504_vm5, %v635_v48 }
 0x300   : > { %v1217_v49 = vpop.trf.xlu2 }
 0x301   : > { %v1221_v50 = vunpack.i.h.bf16 %v1217_v49  ;;  %v1218_v51 = vunpack.i.l.bf16 %v1217_v49 }
 0x303   : > { %v652_v52 = vpack.c.bf16 %v1221_v50, %v1221_v50  ;;  %v636_v53 = vpack.c.bf16 %v1218_v51, %v1218_v51 }
 0x305   : > { %684 = vst.msk [vmem:[%s1644_s3 + $0x7c] sm:$0xf] %vm504_vm5, %v652_v52 }
 0x306   : > { %668 = vst.msk [vmem:[%s1644_s3 + $0x3c] sm:$0xf] %vm504_vm5, %v636_v53 }
 0x307 PF: > { %s875_s30 = sand.u32 1, %s1374_s13   ;;  %p1802_p11 = scmp.ge.s32.totalorder %s1386_s16, 2 }
 0x308   : > { %s876_s17 = scalar_lea.sflag [#allocation4], %s875_s30 }
 0x309   : > { %p1085_p10 = pnand %p1802_p11, %p1506_p12 }
 0x30b   : > { %p1086_p2 = pneg %p1085_p10 }
 0x30d   : > { %1365 = dma.done.wait (%p1086_p2), %s876_s17, 128  }
 0x30e   : > { %1367 = vsyncadd (%p1086_p2), %s876_s17, 4294967168  ;;  %s1803_s15 = sadd.s32 4294967294, %s1386_s16  }
 0x30f   : > { %s893_s18 = sand.u32 1, %s1803_s15  }
 0x310   : > { %s894_s29 = scalar_lea.sflag [#allocation7], %s893_s18 }
 0x311   : > { %1369 = dma.done.wait (%p1086_p2), %s894_s29, 512  }
 0x312   : > { %1371 = vsyncadd (%p1086_p2), %s894_s29, 4294966784  ;;  %s1804_s16 = sld [smem:[#allocation13_spill]]  ;;  %s1807_s13 = smov %s1378_s14 }
 0x313   : > { %s1805_s3 = sld [smem:[#allocation12_spill]] }
 0x314   : > { %s1806_s15 = sld [smem:[#allocation14_spill]] }
 0x318   : > { %p27_p6 = scmp.ge.s32.totalorder %s1804_s16, 4  }
 0x319   : > { %s1808_s14 = smov %s1805_s3 }
 0x31a   :  { %29 = sbr.rel (!%p27_p6) target bundleno = 13 (0xd), region = 137 }
 0x31f   :  { %910 = vsyncpa [#allocation3], 1 }
 0x320   :  { %912 = vsyncpa [#allocation3 + $0x1], 1 }
 0x321   :  { %913 = vsyncpa [#allocation4], 1 }
 0x322   :  { %915 = vsyncpa [#allocation4 + $0x1], 1 }
 0x323   :  { %916 = vsyncpa [#allocation7], 1 }
 0x324   :  { %918 = vsyncpa [#allocation7 + $0x1], 1 }

</bundles_post_ra>
